<compile_context>
chip_gen: v6e
topology: v6e:2x2x1
jax: 0.10.0
libtpu: 0.0.40
codegen_flags: <defaults>
</compile_context>

<pallas_src>
import jax
import jax.numpy as jnp
from jax.experimental import pallas as pl
from jax.experimental.pallas import tpu as pltpu


# ---------------------------------------------------------------------------
# Kernels
# ---------------------------------------------------------------------------

def _fused_proj_kernel(x_ref, w_ref, b_ref, o_ref):
    """One row-tile of the fused Q|K|V projection: o = x @ W_fused + b_fused."""
    o_ref[0] = (jnp.dot(x_ref[0], w_ref[...],
                        preferred_element_type=jnp.float32)
                + b_ref[...]).astype(o_ref.dtype)


def _attention_kernel(gamma_ref,      # SMEM (1,) f32
                      q_ref,          # (1, TQ, C8)
                      kt_ref,         # (1, C8, HW)  K transposed, HW lane-dense
                      v_ref,          # (1, HW, C)
                      xr_ref,         # (1, TQ, C)   residual rows of x
                      o_ref):         # (1, TQ, C)
    cd = v_ref.dtype

    # Scores: canonical (TQ, C8) @ (C8, HW) MXU matmul, f32 accumulation.
    s = jnp.dot(q_ref[0], kt_ref[0],
                preferred_element_type=jnp.float32)            # (TQ, HW) f32

    # Numerically-stable softmax with DEFERRED normalization.
    s_max = jnp.max(s, axis=-1, keepdims=True)                 # (TQ, 1)
    p = jnp.exp(s - s_max)                                     # (TQ, HW) f32
    denom = jnp.sum(p, axis=-1, keepdims=True)                 # (TQ, 1)
    inv = pl.reciprocal(denom, approx=True)                    # EUP vrcp slot
    inv = inv * (2.0 - denom * inv)                            # Newton step -> ~f32 exact

    # P @ V in the native dtype (bf16 fast path), f32 accumulation, then the
    # deferred (TQ, C) normalization instead of a (TQ, HW) one.
    out = jnp.dot(p.astype(cd), v_ref[0],
                  preferred_element_type=jnp.float32) * inv    # (TQ, C) f32

    gamma = gamma_ref[0]
    o_ref[0] = (gamma * out + xr_ref[0].astype(jnp.float32)).astype(o_ref.dtype)


# ---------------------------------------------------------------------------
# Tiling / VMEM helpers
# ---------------------------------------------------------------------------

def _pick_tile(hw, budget_bytes=4 << 20):
    """Largest query-tile (multiple of 8, <= 512) keeping the f32 (TQ, HW)
    score tile under ~budget_bytes.  Prefers a divisor of hw (no padding);
    otherwise returns the cap and the caller zero-pads the query axis."""
    cap = max(8, min(512, (budget_bytes // (4 * max(hw, 1))) // 8 * 8))
    if hw <= cap:
        return hw
    for t in range(cap, 7, -8):
        if hw % t == 0:
            return t
    return cap


def _clamp_vmem(nbytes):
    # Explicit scoped-VMEM request: enough to double-buffer, but safely below
    # v7x's 64 MiB physical VMEM (and well below v5e/v6e's 128 MiB).
    return int(min(48 << 20, max(16 << 20, nbytes)))


# ---------------------------------------------------------------------------
# pallas_call wrappers
# ---------------------------------------------------------------------------

def _fused_projection(x, w_fused, b_fused, *, tm):
    """(B, HWp, C) @ (C, N) + b  ->  (B, HWp, N), tiled over (batch, rows)."""
    B, HWp, C = x.shape
    N = w_fused.shape[1]
    isz = jnp.dtype(x.dtype).itemsize
    est = 2 * (tm * C + C * N + N + tm * N) * isz + tm * N * 4 + (2 << 20)
    return pl.pallas_call(
        _fused_proj_kernel,
        out_shape=jax.ShapeDtypeStruct((B, HWp, N), x.dtype),
        grid_spec=pltpu.PrefetchScalarGridSpec(
            num_scalar_prefetch=0,
            grid=(B, HWp // tm),
            in_specs=[
                pl.BlockSpec((1, tm, C), lambda b, i: (b, i, 0)),
                pl.BlockSpec((C, N), lambda b, i: (0, 0)),        # loaded once
                pl.BlockSpec((1, N), lambda b, i: (0, 0)),        # loaded once
            ],
            out_specs=pl.BlockSpec((1, tm, N), lambda b, i: (b, i, 0)),
        ),
        compiler_params=pltpu.CompilerParams(
            dimension_semantics=("parallel", "parallel"),
            vmem_limit_bytes=_clamp_vmem(est),
        ),
    )(x, w_fused, b_fused)


def _attention(gamma, q, kt, v, xr, *, tq):
    """Softmax(Q K^T) V with residual, tiled over (batch, query-row tile)."""
    B, HWp, C8 = q.shape
    _, HW, C = v.shape
    cd = v.dtype
    isz = jnp.dtype(cd).itemsize
    per_blk = (tq * C8 + C8 * HW + HW * C + 2 * tq * C) * isz
    est = 2 * per_blk + 3 * tq * HW * 4 + (2 << 20)   # double buffers + f32 score temps
    return pl.pallas_call(
        _attention_kernel,
        out_shape=jax.ShapeDtypeStruct((B, HWp, C), cd),
        grid_spec=pltpu.PrefetchScalarGridSpec(
            num_scalar_prefetch=0,
            grid=(B, HWp // tq),
            in_specs=[
                pl.BlockSpec(memory_space=pltpu.MemorySpace.SMEM),   # gamma
                pl.BlockSpec((1, tq, C8), lambda b, i: (b, i, 0)),   # Q tile
                pl.BlockSpec((1, C8, HW), lambda b, i: (b, 0, 0)),   # K^T (per batch)
                pl.BlockSpec((1, HW, C), lambda b, i: (b, 0, 0)),    # V   (per batch)
                pl.BlockSpec((1, tq, C), lambda b, i: (b, i, 0)),    # residual tile
            ],
            out_specs=pl.BlockSpec((1, tq, C), lambda b, i: (b, i, 0)),
        ),
        compiler_params=pltpu.CompilerParams(
            # K/V are inputs (no scratch cache), so both axes are independent.
            dimension_semantics=("parallel", "parallel"),
            vmem_limit_bytes=_clamp_vmem(est),
        ),
    )(gamma, q, kt, v, xr)


# ---------------------------------------------------------------------------
# Public entry points
# ---------------------------------------------------------------------------

def attention_block_bhwc(x, params, *, tq=None):
    """AttentionBlock forward on channel-last activations.  x: (B, HW, C)."""
    B, HW, C = x.shape
    C8 = C // 8
    cd = x.dtype

    if tq is None:
        tq = _pick_tile(HW)
    hw_pad = ((HW + tq - 1) // tq) * tq

    # Fused, pre-transposed projection weights: one wide MXU pass for Q|K|V.
    w_fused = jnp.concatenate(
        [jnp.asarray(params["wq"], cd).T,
         jnp.asarray(params["wk"], cd).T,
         jnp.asarray(params["wv"], cd).T], axis=1)                    # (C, 2*C8 + C)
    b_fused = jnp.concatenate(
        [jnp.asarray(params["bq"], jnp.float32),
         jnp.asarray(params["bk"], jnp.float32),
         jnp.asarray(params["bv"], jnp.float32)]).reshape(1, 2 * C8 + C)
    gamma = jnp.asarray(params["gamma"], jnp.float32).reshape(1)

    x_pad = x if hw_pad == HW else jnp.pad(x, ((0, 0), (0, hw_pad - HW), (0, 0)))

    qkv = _fused_projection(x_pad, w_fused, b_fused, tm=tq)           # (B, hw_pad, 2C8+C)
    q = qkv[:, :, :C8]                                                # (B, hw_pad, C8)
    # Keys/values must cover exactly the real HW positions (softmax over keys);
    # these wrapper-level slices/transpose are cheap XLA ops on the small K/V.
    k = qkv[:, :HW, C8:2 * C8]                                        # (B, HW, C8)
    v = qkv[:, :HW, 2 * C8:]                                          # (B, HW, C)
    kt = jnp.transpose(k, (0, 2, 1))                                  # (B, C8, HW)

    out = _attention(gamma, q, kt, v, x_pad, tq=tq)                   # (B, hw_pad, C)
    return out[:, :HW, :] if hw_pad != HW else out


def attention_block(x_nchw, params, **kwargs):
    """NCHW convenience wrapper matching the PyTorch module interface.

    The two transposes are full HBM round trips of the activation tensor; keep
    the surrounding model channel-last (attention_block_bhwc) to avoid them.
    """
    B, C, H, W = x_nchw.shape
    x = jnp.transpose(x_nchw.reshape(B, C, H * W), (0, 2, 1))         # (B, HW, C)
    y = attention_block_bhwc(x, params, **kwargs)
    return jnp.transpose(y, (0, 2, 1)).reshape(B, C, H, W)


# ---------------------------------------------------------------------------
# Pure-JAX reference (mirrors the PyTorch forward pass)
# ---------------------------------------------------------------------------

def _reference(x_nchw, params):
    B, C, H, W = x_nchw.shape
    HW = H * W
    hp = jax.lax.Precision.HIGHEST
    xf = x_nchw.reshape(B, C, HW)                                     # (B, C, HW)
    lin = lambda w, b: jnp.einsum("oc,bcn->bon", w, xf, precision=hp) + b[None, :, None]
    q = jnp.transpose(lin(params["wq"], params["bq"]), (0, 2, 1))     # (B, HW, C8)
    k = lin(params["wk"], params["bk"])                               # (B, C8, HW)
    v = lin(params["wv"], params["bv"])                               # (B, C, HW)
    attn = jax.nn.softmax(jnp.einsum("bnc,bcm->bnm", q, k, precision=hp), axis=-1)
    out = jnp.einsum("bcm,bnm->bcn", v, attn, precision=hp).reshape(B, C, H, W)
    return params["gamma"][0] * out + x_nchw


if __name__ == "__main__":
    key = jax.random.PRNGKey(0)
    B, C, H, W = 2, 32, 8, 8          # in_channels=32 -> query/key channels = 4
    C8 = C // 8

    keys = jax.random.split(key, 7)
    params = {
        "wq": jax.random.normal(keys[0], (C8, C), jnp.float32) * 0.1,
        "bq": jax.random.normal(keys[1], (C8,), jnp.float32) * 0.1,
        "wk": jax.random.normal(keys[2], (C8, C), jnp.float32) * 0.1,
        "bk": jax.random.normal(keys[3], (C8,), jnp.float32) * 0.1,
        "wv": jax.random.normal(keys[4], (C, C), jnp.float32) * 0.1,
        "bv": jax.random.normal(keys[5], (C,), jnp.float32) * 0.1,
        # PyTorch inits gamma to 0 (output == x); use a nonzero value so the
        # attention path is actually exercised by the test.
        "gamma": jnp.array([0.5], jnp.float32),
    }
    x = jax.random.normal(keys[6], (B, C, H, W), jnp.float32)

    y_ref = _reference(x, params)

    # f32 path.
    y = attention_block(x, params)
    jax.block_until_ready(y)
    assert jnp.allclose(y, y_ref, atol=2e-3, rtol=2e-3), "f32 mismatch vs reference"

    # bf16 fast-MXU path (f32 accumulation inside the kernels).
    y_bf = attention_block(x.astype(jnp.bfloat16), params)
    jax.block_until_ready(y_bf)
    assert jnp.allclose(y_bf.astype(jnp.float32), y_ref, atol=1e-1, rtol=1e-1), \
        "bf16 mismatch vs reference"

    print("KERNEL_OK")
</pallas_src>

<mosaic_0001>
module attributes {stable_mosaic.version = 11 : i64} {
  func.func @_fused_proj_kernel(%arg0: i32, %arg1: i32, %arg2: memref<1x64x32xf32, #tpu.memory_space<vmem>>, %arg3: memref<32x40xf32, #tpu.memory_space<vmem>>, %arg4: memref<1x40xf32, #tpu.memory_space<vmem>>, %arg5: memref<1x64x40xf32, #tpu.memory_space<vmem>>) attributes {dimension_semantics = [#tpu.dimension_semantics<parallel>, #tpu.dimension_semantics<parallel>], iteration_bounds = array<i64: 2, 1>, scalar_prefetch = 0 : i64, scratch_operands = 0 : i64, tpu.core_type = #tpu.core_type<tc>, window_params = [{transform_indices = @transform_0, window_bounds = array<i64: 1, 64, 32>}, {pipeline_mode = #tpu.pipeline_mode<synchronous>, transform_indices = @transform_1, window_bounds = array<i64: 32, 40>}, {pipeline_mode = #tpu.pipeline_mode<synchronous>, transform_indices = @transform_2, window_bounds = array<i64: 1, 40>}, {transform_indices = @transform_3, window_bounds = array<i64: 1, 64, 40>}]} {
    %c0 = arith.constant 0 : index
    %c0_0 = arith.constant 0 : index
    %c0_1 = arith.constant 0 : index
    %0 = vector.load %arg2[%c0, %c0_0, %c0_1] : memref<1x64x32xf32, #tpu.memory_space<vmem>>, vector<1x64x32xf32>
    %1 = vector.shape_cast %0 : vector<1x64x32xf32> to vector<64x32xf32>
    %c0_2 = arith.constant 0 : index
    %c0_3 = arith.constant 0 : index
    %2 = vector.load %arg3[%c0_2, %c0_3] : memref<32x40xf32, #tpu.memory_space<vmem>>, vector<32x40xf32>
    %cst = arith.constant dense<0.000000e+00> : vector<64x40xf32>
    %3 = tpu.matmul %1, %2, %cst {dimension_numbers = #tpu.dot_dimension_numbers<[1], [0], [0], [1], [0, 0, 1, 1], [], []>} : vector<64x32xf32>, vector<32x40xf32>, vector<64x40xf32> -> vector<64x40xf32>
    %c0_4 = arith.constant 0 : index
    %c0_5 = arith.constant 0 : index
    %4 = vector.load %arg4[%c0_4, %c0_5] : memref<1x40xf32, #tpu.memory_space<vmem>>, vector<1x40xf32>
    %5 = vector.broadcast %4 : vector<1x40xf32> to vector<64x40xf32>
    %6 = arith.addf %3, %5 : vector<64x40xf32>
    %c0_6 = arith.constant 0 : index
    %c0_7 = arith.constant 0 : index
    %c0_8 = arith.constant 0 : index
    %7 = vector.load %arg5[%c0_6, %c0_7, %c0_8] : memref<1x64x40xf32, #tpu.memory_space<vmem>>, vector<1x64x40xf32>
    %8 = vector.shape_cast %7 : vector<1x64x40xf32> to vector<64x40xf32>
    %9 = vector.shape_cast %6 : vector<64x40xf32> to vector<1x64x40xf32>
    tpu.vector_store %arg5[%c0_6, %c0_7, %c0_8], %9 {strides = array<i32>} : memref<1x64x40xf32, #tpu.memory_space<vmem>>, vector<1x64x40xf32>,
    return
  }
  func.func @transform_0(%arg0: i32, %arg1: i32) -> (i32, i32, i32) {
    %c0_i32 = arith.constant 0 : i32
    %c0_i32_0 = arith.constant 0 : i32
    return %arg0, %arg1, %c0_i32 : i32, i32, i32
  }
  func.func @transform_1(%arg0: i32, %arg1: i32) -> (i32, i32) {
    %c0_i32 = arith.constant 0 : i32
    %c0_i32_0 = arith.constant 0 : i32
    %c0_i32_1 = arith.constant 0 : i32
    return %c0_i32, %c0_i32_0 : i32, i32
  }
  func.func @transform_2(%arg0: i32, %arg1: i32) -> (i32, i32) {
    %c0_i32 = arith.constant 0 : i32
    %c0_i32_0 = arith.constant 0 : i32
    %c0_i32_1 = arith.constant 0 : i32
    return %c0_i32, %c0_i32_0 : i32, i32
  }
  func.func @transform_3(%arg0: i32, %arg1: i32) -> (i32, i32, i32) {
    %c0_i32 = arith.constant 0 : i32
    %c0_i32_0 = arith.constant 0 : i32
    return %arg0, %arg1, %c0_i32 : i32, i32, i32
  }
}

</mosaic_0001>

<bundles_post_ra>
// kernel: tpu_custom_call.1
= control target key start
LH: loop header
LB: loop body
LE: loop exit
PB: predicated region body
PF: predicated region fallthrough
CT: control target
= control target key end

     0   :  { %s585_s12 = smov 0   ;;  %s587_s13 = smov 0   ;;  %s652_s0 = inlined_call_operand.vmem [shape: f32[2,64,32], index: 0, kind: input, shape index: {}]   ;;  %s653_s1 = inlined_call_operand.vmem [shape: f32[32,40], index: 1, kind: input, shape index: {}]   ;;  %s654_s2 = inlined_call_operand.vmem [shape: f32[1,40], index: 2, kind: input, shape index: {}]   ;;  %s655_s3 = inlined_call_operand.vmem [shape: f32[2,64,40], index: 3, kind: output, shape index: {}]  }
   0x1   :  { %s589_s14 = smov 0  }
   0x2 LB: > { %s25_s15 = sadd.s32 1, %s559_s13  ;;  %p459_p0 = scmp.ge.s32.totalorder %s563_s14, 1  ;;  %s563_s14 = sphi %s589_s14, %s13_s14   ;;  %s559_s13 = sphi %s587_s13, %s657_s13   ;;  %s555_s12 = sphi %s585_s12, %s656_s12  }
   0x3   : > { %p27_p1 = scmp.ge.s32.totalorder %s25_s15, 2  ;;  %p158_p2 = scmp.lt.s32.totalorder %s563_s14, 3 }
   0x5   : > { %s659_s15 = smov (%p27_p1, %s25_s15), 0  ;;  %p159_p3 = pnand %p459_p0, %p158_p2 }
   0x6   : > { %p191_p4 = scmp.lt.s32.totalorder (!%p159_p3), %s555_s12, 1 }
   0x7   : > { %162 = sbr.rel (%p159_p3) target bundleno = 224 (0xe0), region = 32 }
   0xc   : > { %v221_v0 = vld [vmem:[%s653_s1 + $0x18] sm:$0xff]  ;;  %v220_v1 = vld [vmem:[%s653_s1 + $0x10] sm:$0xff]  ;;  %v219_v2 = vld [vmem:[%s653_s1 + $0x8] sm:$0xff]  ;;  %s661_s12 = smov (!%p191_p4, %s555_s12), 1  ;;  %vm229_vm0 = vcmask 261120   ;;  %vm359_vm1 = vcmask 326656  }
   0xd   : > { %489 = vmatprep.subr.mxu0 %v221_v0  ;;  %509 = vmatprep.subr.mxu1 %v221_v0  ;;  %v218_v3 = vld [vmem:[%s653_s1] sm:$0xff]  ;;  %s475_s24 = sshll.u32 %s661_s12, 6 }
   0xe   : > { %490 = vmatpush3.msra.mxu0 %v221_v0  ;;  %513 = vmatpush3.msra.mxu1 %v221_v0  ;;  %s198_s27 = scalar_lea.vmem %s652_s0, %s475_s24  ;;  %v464_v12 = vld [vmem:[%s654_s2] ss:$0 sm:$0xff]  ;;  %s208_s5 = scalar_lea.vmem %s655_s3, %s475_s24 }
   0xf   : > { %491 = vmatprep.subr.mxu0 %v220_v1  ;;  %510 = vmatprep.subr.mxu1 %v220_v1  ;;  %v210_v4 = vld [vmem:[%s198_s27] sm:$0xff]  ;;  %v211_v6 = vld [vmem:[%s198_s27 + $0x8] sm:$0xff]  ;;  %v212_v8 = vld [vmem:[%s198_s27 + $0x10] sm:$0xff] }
  0x10   : > { %492 = vmatpush3.msra.mxu0 %v220_v1  ;;  %514 = vmatpush3.msra.mxu1 %v220_v1  ;;  %v214_v5 = vld [vmem:[%s198_s27 + $0x20] sm:$0xff]  ;;  %v215_v7 = vld [vmem:[%s198_s27 + $0x28] sm:$0xff]  ;;  %v216_v9 = vld [vmem:[%s198_s27 + $0x30] sm:$0xff] }
  0x11   : > { %493 = vmatprep.subr.mxu0 %v219_v2  ;;  %511 = vmatprep.subr.mxu1 %v219_v2  ;;  %v213_v10 = vld [vmem:[%s198_s27 + $0x18] sm:$0xff] }
  0x12   : > { %494 = vmatpush3.msra.mxu0 %v219_v2  ;;  %515 = vmatpush3.msra.mxu1 %v219_v2  ;;  %v217_v11 = vld [vmem:[%s198_s27 + $0x38] sm:$0xff] }
  0x13   : > { %495 = vmatprep.subr.mxu0 %v218_v3  ;;  %512 = vmatprep.subr.mxu1 %v218_v3 }
  0x14   : > { %496 = vmatpush3.msra.mxu0 %v218_v3  ;;  %516 = vmatpush3.msra.mxu1 %v218_v3 }
  0x15   : > { %497 = vmatprep.mubr.msk.f32.mxu0 %vm229_vm0, %v210_v4  ;;  %503 = vmatprep.mubr.msk.f32.mxu1 %vm229_vm0, %v214_v5 }
  0x16   : > { %498 = vmatmul.mubr.msk.f32.vlgmr.msra.gmra.mxu0 %vm229_vm0, %v211_v6  ;;  %504 = vmatmul.mubr.msk.f32.vlgmr.msra.gmra.mxu1 %vm229_vm0, %v215_v7 }
  0x17   : > { %500 = vmatprep.mubr.msk.f32.mxu0 %vm229_vm0, %v212_v8  ;;  %506 = vmatprep.mubr.msk.f32.mxu1 %vm229_vm0, %v216_v9 }
  0x1a   : > { %501 = vmatmul.mubr.msk.f32.gmra.mxu0 %vm229_vm0, %v213_v10  ;;  %507 = vmatmul.mubr.msk.f32.gmra.mxu1 %vm229_vm0, %v217_v11 }
  0xd6   : > { %v499_v13 = vpop.f32.mrf.mxu0  ;;  %v505_v14 = vpop.f32.mrf.mxu1 }
  0xd7   : > { %v326_v15 = vadd.f32 %v499_v13, %v464_v12  ;;  %v346_v16 = vadd.f32 %v505_v14, %v464_v12 }
  0xd8   : > { %v320_v17 = vpop.f32.mrf.mxu0  ;;  %v340_v18 = vpop.f32.mrf.mxu1 }
  0xd9   : > { %361 = vst.msk [vmem:[%s208_s5 + $0x8] sm:$0xff] %vm359_vm1, %v326_v15  ;;  %365 = vst.msk [vmem:[%s208_s5 + $0x28] sm:$0xff] %vm359_vm1, %v346_v16  ;;  %v321_v19 = vadd.f32 %v464_v12, %v320_v17  ;;  %v341_v20 = vadd.f32 %v464_v12, %v340_v18 }
  0xda   : > { %v502_v21 = vpop.f32.mrf.mxu0  ;;  %v508_v22 = vpop.f32.mrf.mxu1 }
  0xdb   : > { %360 = vst.msk [vmem:[%s208_s5] sm:$0xff] %vm359_vm1, %v321_v19  ;;  %364 = vst.msk [vmem:[%s208_s5 + $0x20] sm:$0xff] %vm359_vm1, %v341_v20  ;;  %v336_v23 = vadd.f32 %v502_v21, %v464_v12  ;;  %v356_v24 = vadd.f32 %v508_v22, %v464_v12 }
  0xdc   : > { %v330_v25 = vpop.f32.mrf.mxu0  ;;  %v350_v26 = vpop.f32.mrf.mxu1 }
  0xdd   : > { %363 = vst.msk [vmem:[%s208_s5 + $0x18] sm:$0xff] %vm359_vm1, %v336_v23  ;;  %367 = vst.msk [vmem:[%s208_s5 + $0x38] sm:$0xff] %vm359_vm1, %v356_v24  ;;  %v331_v27 = vadd.f32 %v464_v12, %v330_v25  ;;  %v351_v28 = vadd.f32 %v464_v12, %v350_v26 }
  0xdf   : > { %362 = vst.msk [vmem:[%s208_s5 + $0x10] sm:$0xff] %vm359_vm1, %v331_v27  ;;  %366 = vst.msk [vmem:[%s208_s5 + $0x30] sm:$0xff] %vm359_vm1, %v351_v28 }
  0xe0 PF: > { %s13_s14 = sadd.s32 1, %s563_s14   ;;  %s656_s12 = smov %s559_s13 }
  0xe1   : > { %p10_p5 = scmp.ge.s32.totalorder %s13_s14, 4   ;;  %s657_s13 = smov %s659_s15 }
  0xe3   :  { %12 = sbr.rel (!%p10_p5) target bundleno = 2 (0x2), region = 62 }

</bundles_post_ra>
